<compile_context>
chip_gen: v5e
topology: v5e:2x2
jax: 0.10.0
libtpu: 0.0.40
codegen_flags: <defaults>
</compile_context>

<pallas_src>
import math

import jax
import jax.numpy as jnp
import numpy as np
from jax.experimental import pallas as pl
from jax.experimental.pallas import tpu as pltpu


def _round_up(x, m):
    return (x + m - 1) // m * m


# ---------------------------------------------------------------------------
# Kernel
# ---------------------------------------------------------------------------
def eltm_kernel(x_ref, h_ref,
                wx3_ref, wh3_ref, b_in_ref,
                wo3_ref, b_o_ref, wab_ref,
                out_ref):
    """One batch tile of the ELTM cell. All feature dims are padded to 128."""
    f32 = jnp.float32
    Hp = out_ref.shape[-1]

    x = x_ref[...]
    h = h_ref[...]

    # Fused input projections (4 small matmuls -> 2):
    #   px = x @ [w_in_x(i-half) | w_in_x(h-half) | w_only_x]  -> (tb, 3Hp)
    #   ph = h @ [w_hid_in(i)    | w_hid_in(h)    | w_only_h]  -> (tb, 3Hp)
    px = jnp.dot(x, wx3_ref[...], preferred_element_type=f32)
    ph = jnp.dot(h, wh3_ref[...], preferred_element_type=f32)

    gates = px[:, :2 * Hp] + ph[:, :2 * Hp] + b_in_ref[...]
    i_gate = jax.nn.sigmoid(gates[:, :Hp])
    h_gate = jnp.tanh(gates[:, Hp:])
    ch_n = i_gate * h_gate

    x_t = jnp.tanh(px[:, 2 * Hp:])      # tanh(only_x(x))
    h_t = jnp.tanh(ph[:, 2 * Hp:])      # tanh(only_h(hidden))

    # Fused output-gate matmul: concat along K (3 matmuls -> 1).
    cat = jnp.concatenate([x_t, h_t, ch_n], axis=-1)
    o_gate = jax.nn.sigmoid(
        jnp.dot(cat.astype(wo3_ref.dtype), wo3_ref[...],
                preferred_element_type=f32) + b_o_ref[...])

    # Fused alpha / beta matmul (2 -> 1).
    ab = jnp.dot(o_gate.astype(wab_ref.dtype), wab_ref[...],
                 preferred_element_type=f32)
    alpha = ab[:, :Hp]
    beta = ab[:, Hp:]

    # alpha*x_t + beta*h_t + (1-alpha-beta)*ch_n, without materializing gamma.
    out = ch_n + alpha * (x_t - ch_n) + beta * (h_t - ch_n)
    out_ref[...] = out.astype(out_ref.dtype)


# ---------------------------------------------------------------------------
# Wrapper
# ---------------------------------------------------------------------------
def eltm_cell(x, hidden, fused_params, *, batch_tile=256):
    """x: (B, input_size), hidden: (B, H) -> h_next: (B, H)."""
    wx3, wh3, b_in, wo3, b_o, wab = fused_params
    B, I = x.shape
    H = hidden.shape[-1]
    Hp = wab.shape[0]                       # padded hidden size (multiple of 128)

    # Batch tiling: tile is a multiple of 8 (sublane); batch padded to a tile
    # multiple so every grid step sees a full (tb, *) block.
    tb = min(batch_tile, _round_up(B, 8))
    Bp = _round_up(B, tb)

    x_p = jnp.zeros((Bp, I), x.dtype).at[:B].set(x)
    h_p = jnp.zeros((Bp, Hp), hidden.dtype).at[:B, :H].set(hidden)

    grid = (Bp // tb,)
    const = lambda i: (0, 0)                # weights: VMEM-resident, no re-DMA
    tile = lambda i: (i, 0)                 # activations: tiled over batch

    weight_specs = [
        pl.BlockSpec(wx3.shape, const),
        pl.BlockSpec(wh3.shape, const),
        pl.BlockSpec(b_in.shape, const),
        pl.BlockSpec(wo3.shape, const),
        pl.BlockSpec(b_o.shape, const),
        pl.BlockSpec(wab.shape, const),
    ]

    # Size the scoped VMEM limit to the real footprint (default 16/32 MiB is
    # far below physical once H grows); clamp to 64 MiB (v7x physical).
    itemsize = jnp.dtype(x.dtype).itemsize
    w_bytes = sum(int(np.prod(a.shape)) * jnp.dtype(a.dtype).itemsize
                  for a in fused_params)
    io_bytes = 2 * 2 * (tb * I + 2 * tb * Hp) * itemsize   # double-buffered x/h/out
    scratch_bytes = 8 * tb * 3 * Hp * 4                    # in-kernel temporaries
    vmem_limit = int(min(max(w_bytes + io_bytes + scratch_bytes + (4 << 20),
                             32 << 20), 64 << 20))

    out_p = pl.pallas_call(
        eltm_kernel,
        out_shape=jax.ShapeDtypeStruct((Bp, Hp), x.dtype),
        grid=grid,
        in_specs=[pl.BlockSpec((tb, I), tile),
                  pl.BlockSpec((tb, Hp), tile)] + weight_specs,
        out_specs=pl.BlockSpec((tb, Hp), tile),
        compiler_params=pltpu.CompilerParams(
            dimension_semantics=("parallel",),
            vmem_limit_bytes=vmem_limit),
    )(x_p, h_p, wx3, wh3, b_in, wo3, b_o, wab)

    return out_p[:B, :H]


# ---------------------------------------------------------------------------
# Parameters
# ---------------------------------------------------------------------------
def init_params(key, input_size, hidden_size, dtype=jnp.float32):
    """nn.Linear-style init. Weights already transposed to (in, out)."""
    H = hidden_size

    def lin(key, fan_in, fan_out):
        k = 1.0 / math.sqrt(fan_in)
        return jax.random.uniform(key, (fan_in, fan_out), dtype, -k, k)

    def bias(key, fan_in, fan_out):
        k = 1.0 / math.sqrt(fan_in)
        return jax.random.uniform(key, (1, fan_out), dtype, -k, k)

    keys = jax.random.split(key, 11)
    w_in_x = lin(keys[0], input_size, 2 * H)   # input_in  (no bias)
    w_in_h = lin(keys[1], H, 2 * H)            # hidden_in
    b_in = bias(keys[2], H, 2 * H)             # hidden_in bias
    w_ox = lin(keys[3], input_size, H)         # only_x    (no bias)
    w_oh = lin(keys[4], H, H)                  # only_h    (no bias)
    w_io = lin(keys[5], H, H)                  # input_out (no bias)
    w_ho = lin(keys[6], H, H)                  # hidden_out (no bias)
    w_cho = lin(keys[7], H, H)                 # candidate_hidden_out
    b_cho = bias(keys[8], H, H)                # candidate_hidden_out bias
    w_a = lin(keys[9], H, H)                   # alpha_p   (no bias)
    w_b = lin(keys[10], H, H)                  # beta_p    (no bias)
    return (w_in_x, w_in_h, b_in, w_ox, w_oh, w_io, w_ho, w_cho, b_cho,
            w_a, w_b)


def fuse_params(params, input_size, hidden_size, dtype=None):
    """Concatenate + zero-pad the 9 Linear weights into 4 fused matrices.

    The hidden dim is padded to Hp = round_up(H, 128) so every gate boundary
    lands on a 128-lane multiple. Padded rows/cols are zero, so the padded
    lanes of the result are exactly zero and get sliced off in the wrapper.
    Optionally cast weights to `dtype` (e.g. bf16 on v6e/v7x) — the kernel
    still accumulates in f32.
    """
    (w_in_x, w_in_h, b_in, w_ox, w_oh, w_io, w_ho, w_cho, b_cho,
     w_a, w_b) = params
    H, I = hidden_size, input_size
    Hp = _round_up(H, 128)

    def pad(w, rows, cols):
        return jnp.zeros((rows, cols), w.dtype).at[:w.shape[0], :w.shape[1]].set(w)

    wx3 = jnp.concatenate([pad(w_in_x[:, :H], I, Hp),      # i-gate half
                           pad(w_in_x[:, H:], I, Hp),      # h-gate half
                           pad(w_ox, I, Hp)], axis=1)      # only_x
    wh3 = jnp.concatenate([pad(w_in_h[:, :H], Hp, Hp),
                           pad(w_in_h[:, H:], Hp, Hp),
                           pad(w_oh, Hp, Hp)], axis=1)     # only_h
    b_in_p = jnp.concatenate([pad(b_in[:, :H], 1, Hp),
                              pad(b_in[:, H:], 1, Hp)], axis=1)
    wo3 = jnp.concatenate([pad(w_io, Hp, Hp),               # K = [x_t; h_t; ch_n]
                           pad(w_ho, Hp, Hp),
                           pad(w_cho, Hp, Hp)], axis=0)
    b_o_p = pad(b_cho, 1, Hp)
    wab = jnp.concatenate([pad(w_a, Hp, Hp),
                           pad(w_b, Hp, Hp)], axis=1)

    if dtype is not None:
        wx3, wh3, wo3, wab = (a.astype(dtype) for a in (wx3, wh3, wo3, wab))
    return (wx3, wh3, b_in_p, wo3, b_o_p, wab)


# ---------------------------------------------------------------------------
# Pure-JAX reference (mirrors the PyTorch forward)
# ---------------------------------------------------------------------------
def eltm_reference(x, h, params):
    (w_in_x, w_in_h, b_in, w_ox, w_oh, w_io, w_ho, w_cho, b_cho,
     w_a, w_b) = params
    H = h.shape[-1]
    gates = x @ w_in_x + h @ w_in_h + b_in
    i_gate = jax.nn.sigmoid(gates[:, :H])
    h_gate = jnp.tanh(gates[:, H:])
    ch_n = i_gate * h_gate
    x_t = jnp.tanh(x @ w_ox)
    h_t = jnp.tanh(h @ w_oh)
    o_gate = jax.nn.sigmoid(x_t @ w_io + h_t @ w_ho + ch_n @ w_cho + b_cho)
    alpha = o_gate @ w_a
    beta = o_gate @ w_b
    gamma = 1 - alpha - beta
    return alpha * x_t + beta * h_t + gamma * ch_n


if __name__ == "__main__":
    B, input_size, hidden_size = 8, 16, 32

    key = jax.random.PRNGKey(0)
    k_x, k_h, k_p = jax.random.split(key, 3)
    x = jax.random.normal(k_x, (B, input_size), jnp.float32)
    hidden = jax.random.normal(k_h, (B, hidden_size), jnp.float32)

    params = init_params(k_p, input_size, hidden_size)
    fused = fuse_params(params, input_size, hidden_size)

    h_next = eltm_cell(x, hidden, fused)
    jax.block_until_ready(h_next)

    h_ref = eltm_reference(x, hidden, params)
    np.testing.assert_allclose(np.asarray(h_next), np.asarray(h_ref),
                               rtol=1e-5, atol=1e-5)
    print("KERNEL_OK")
</pallas_src>

<mosaic_0001>
module attributes {stable_mosaic.version = 11 : i64} {
  func.func @eltm_kernel(%arg0: i32, %arg1: memref<8x16xf32, #tpu.memory_space<vmem>>, %arg2: memref<8x128xf32, #tpu.memory_space<vmem>>, %arg3: memref<16x384xf32, #tpu.memory_space<vmem>>, %arg4: memref<128x384xf32, #tpu.memory_space<vmem>>, %arg5: memref<1x256xf32, #tpu.memory_space<vmem>>, %arg6: memref<384x128xf32, #tpu.memory_space<vmem>>, %arg7: memref<1x128xf32, #tpu.memory_space<vmem>>, %arg8: memref<128x256xf32, #tpu.memory_space<vmem>>, %arg9: memref<8x128xf32, #tpu.memory_space<vmem>>) attributes {dimension_semantics = [#tpu.dimension_semantics<parallel>], iteration_bounds = array<i64: 1>, scalar_prefetch = 0 : i64, scratch_operands = 0 : i64, tpu.core_type = #tpu.core_type<tc>, window_params = [{transform_indices = @transform_0, window_bounds = array<i64: 8, 16>}, {transform_indices = @transform_1, window_bounds = array<i64: 8, 128>}, {pipeline_mode = #tpu.pipeline_mode<synchronous>, transform_indices = @transform_2, window_bounds = array<i64: 16, 384>}, {pipeline_mode = #tpu.pipeline_mode<synchronous>, transform_indices = @transform_3, window_bounds = array<i64: 128, 384>}, {pipeline_mode = #tpu.pipeline_mode<synchronous>, transform_indices = @transform_4, window_bounds = array<i64: 1, 256>}, {pipeline_mode = #tpu.pipeline_mode<synchronous>, transform_indices = @transform_5, window_bounds = array<i64: 384, 128>}, {pipeline_mode = #tpu.pipeline_mode<synchronous>, transform_indices = @transform_6, window_bounds = array<i64: 1, 128>}, {pipeline_mode = #tpu.pipeline_mode<synchronous>, transform_indices = @transform_7, window_bounds = array<i64: 128, 256>}, {transform_indices = @transform_8, window_bounds = array<i64: 8, 128>}]} {
    %c0 = arith.constant 0 : index
    %c0_0 = arith.constant 0 : index
    %0 = vector.load %arg1[%c0, %c0_0] : memref<8x16xf32, #tpu.memory_space<vmem>>, vector<8x16xf32>
    %c0_1 = arith.constant 0 : index
    %c0_2 = arith.constant 0 : index
    %1 = vector.load %arg2[%c0_1, %c0_2] : memref<8x128xf32, #tpu.memory_space<vmem>>, vector<8x128xf32>
    %c0_3 = arith.constant 0 : index
    %c0_4 = arith.constant 0 : index
    %2 = vector.load %arg3[%c0_3, %c0_4] : memref<16x384xf32, #tpu.memory_space<vmem>>, vector<16x384xf32>
    %cst = arith.constant dense<0.000000e+00> : vector<8x384xf32>
    %3 = tpu.matmul %0, %2, %cst {dimension_numbers = #tpu.dot_dimension_numbers<[1], [0], [0], [1], [0, 0, 1, 1], [], []>} : vector<8x16xf32>, vector<16x384xf32>, vector<8x384xf32> -> vector<8x384xf32>
    %c0_5 = arith.constant 0 : index
    %c0_6 = arith.constant 0 : index
    %4 = vector.load %arg4[%c0_5, %c0_6] : memref<128x384xf32, #tpu.memory_space<vmem>>, vector<128x384xf32>
    %cst_7 = arith.constant dense<0.000000e+00> : vector<8x384xf32>
    %5 = tpu.matmul %1, %4, %cst_7 {dimension_numbers = #tpu.dot_dimension_numbers<[1], [0], [0], [1], [0, 0, 1, 1], [], []>} : vector<8x128xf32>, vector<128x384xf32>, vector<8x384xf32> -> vector<8x384xf32>
    %6 = vector.extract_strided_slice %3 {offsets = [0, 0], sizes = [8, 256], strides = [1, 1]} : vector<8x384xf32> to vector<8x256xf32>
    %7 = vector.extract_strided_slice %5 {offsets = [0, 0], sizes = [8, 256], strides = [1, 1]} : vector<8x384xf32> to vector<8x256xf32>
    %8 = arith.addf %6, %7 : vector<8x256xf32>
    %c0_8 = arith.constant 0 : index
    %c0_9 = arith.constant 0 : index
    %9 = vector.load %arg5[%c0_8, %c0_9] : memref<1x256xf32, #tpu.memory_space<vmem>>, vector<1x256xf32>
    %10 = vector.broadcast %9 : vector<1x256xf32> to vector<8x256xf32>
    %11 = arith.addf %8, %10 : vector<8x256xf32>
    %12 = vector.extract_strided_slice %11 {offsets = [0, 0], sizes = [8, 128], strides = [1, 1]} : vector<8x256xf32> to vector<8x128xf32>
    %13 = arith.negf %12 : vector<8x128xf32>
    %14 = math.exp %13 : vector<8x128xf32>
    %cst_10 = arith.constant 1.000000e+00 : f32
    %15 = vector.broadcast %cst_10 : f32 to vector<8x128xf32>
    %16 = arith.addf %15, %14 : vector<8x128xf32>
    %17 = arith.divf %15, %16 : vector<8x128xf32>
    %18 = vector.extract_strided_slice %11 {offsets = [0, 128], sizes = [8, 128], strides = [1, 1]} : vector<8x256xf32> to vector<8x128xf32>
    %19 = math.tanh %18 : vector<8x128xf32>
    %20 = arith.mulf %17, %19 : vector<8x128xf32>
    %21 = vector.extract_strided_slice %3 {offsets = [0, 256], sizes = [8, 128], strides = [1, 1]} : vector<8x384xf32> to vector<8x128xf32>
    %22 = math.tanh %21 : vector<8x128xf32>
    %23 = vector.extract_strided_slice %5 {offsets = [0, 256], sizes = [8, 128], strides = [1, 1]} : vector<8x384xf32> to vector<8x128xf32>
    %24 = math.tanh %23 : vector<8x128xf32>
    %25 = tpu.concatenate %22, %24, %20 in 1 : vector<8x128xf32>, vector<8x128xf32>, vector<8x128xf32> -> vector<8x384xf32>
    %c0_11 = arith.constant 0 : index
    %c0_12 = arith.constant 0 : index
    %26 = vector.load %arg6[%c0_11, %c0_12] : memref<384x128xf32, #tpu.memory_space<vmem>>, vector<384x128xf32>
    %cst_13 = arith.constant dense<0.000000e+00> : vector<8x128xf32>
    %27 = tpu.matmul %25, %26, %cst_13 {dimension_numbers = #tpu.dot_dimension_numbers<[1], [0], [0], [1], [0, 0, 1, 1], [], []>} : vector<8x384xf32>, vector<384x128xf32>, vector<8x128xf32> -> vector<8x128xf32>
    %c0_14 = arith.constant 0 : index
    %c0_15 = arith.constant 0 : index
    %28 = vector.load %arg7[%c0_14, %c0_15] : memref<1x128xf32, #tpu.memory_space<vmem>>, vector<1x128xf32>
    %29 = vector.broadcast %28 : vector<1x128xf32> to vector<8x128xf32>
    %30 = arith.addf %27, %29 : vector<8x128xf32>
    %31 = arith.negf %30 : vector<8x128xf32>
    %32 = math.exp %31 : vector<8x128xf32>
    %cst_16 = arith.constant 1.000000e+00 : f32
    %33 = vector.broadcast %cst_16 : f32 to vector<8x128xf32>
    %34 = arith.addf %33, %32 : vector<8x128xf32>
    %35 = arith.divf %33, %34 : vector<8x128xf32>
    %c0_17 = arith.constant 0 : index
    %c0_18 = arith.constant 0 : index
    %36 = vector.load %arg8[%c0_17, %c0_18] : memref<128x256xf32, #tpu.memory_space<vmem>>, vector<128x256xf32>
    %cst_19 = arith.constant dense<0.000000e+00> : vector<8x256xf32>
    %37 = tpu.matmul %35, %36, %cst_19 {dimension_numbers = #tpu.dot_dimension_numbers<[1], [0], [0], [1], [0, 0, 1, 1], [], []>} : vector<8x128xf32>, vector<128x256xf32>, vector<8x256xf32> -> vector<8x256xf32>
    %38 = vector.extract_strided_slice %37 {offsets = [0, 0], sizes = [8, 128], strides = [1, 1]} : vector<8x256xf32> to vector<8x128xf32>
    %39 = vector.extract_strided_slice %37 {offsets = [0, 128], sizes = [8, 128], strides = [1, 1]} : vector<8x256xf32> to vector<8x128xf32>
    %40 = arith.subf %22, %20 : vector<8x128xf32>
    %41 = arith.mulf %38, %40 : vector<8x128xf32>
    %42 = arith.addf %20, %41 : vector<8x128xf32>
    %43 = arith.subf %24, %20 : vector<8x128xf32>
    %44 = arith.mulf %39, %43 : vector<8x128xf32>
    %45 = arith.addf %42, %44 : vector<8x128xf32>
    %c0_20 = arith.constant 0 : index
    %c0_21 = arith.constant 0 : index
    %46 = vector.load %arg9[%c0_20, %c0_21] : memref<8x128xf32, #tpu.memory_space<vmem>>, vector<8x128xf32>
    tpu.vector_store %arg9[%c0_20, %c0_21], %45 {strides = array<i32>} : memref<8x128xf32, #tpu.memory_space<vmem>>, vector<8x128xf32>,
    return
  }
  func.func @transform_0(%arg0: i32) -> (i32, i32) {
    %c0_i32 = arith.constant 0 : i32
    %c0_i32_0 = arith.constant 0 : i32
    return %arg0, %c0_i32 : i32, i32
  }
  func.func @transform_1(%arg0: i32) -> (i32, i32) {
    %c0_i32 = arith.constant 0 : i32
    %c0_i32_0 = arith.constant 0 : i32
    return %arg0, %c0_i32 : i32, i32
  }
  func.func @transform_2(%arg0: i32) -> (i32, i32) {
    %c0_i32 = arith.constant 0 : i32
    %c0_i32_0 = arith.constant 0 : i32
    %c0_i32_1 = arith.constant 0 : i32
    return %c0_i32, %c0_i32_0 : i32, i32
  }
  func.func @transform_3(%arg0: i32) -> (i32, i32) {
    %c0_i32 = arith.constant 0 : i32
    %c0_i32_0 = arith.constant 0 : i32
    %c0_i32_1 = arith.constant 0 : i32
    return %c0_i32, %c0_i32_0 : i32, i32
  }
  func.func @transform_4(%arg0: i32) -> (i32, i32) {
    %c0_i32 = arith.constant 0 : i32
    %c0_i32_0 = arith.constant 0 : i32
    %c0_i32_1 = arith.constant 0 : i32
    return %c0_i32, %c0_i32_0 : i32, i32
  }
  func.func @transform_5(%arg0: i32) -> (i32, i32) {
    %c0_i32 = arith.constant 0 : i32
    %c0_i32_0 = arith.constant 0 : i32
    %c0_i32_1 = arith.constant 0 : i32
    return %c0_i32, %c0_i32_0 : i32, i32
  }
  func.func @transform_6(%arg0: i32) -> (i32, i32) {
    %c0_i32 = arith.constant 0 : i32
    %c0_i32_0 = arith.constant 0 : i32
    %c0_i32_1 = arith.constant 0 : i32
    return %c0_i32, %c0_i32_0 : i32, i32
  }
  func.func @transform_7(%arg0: i32) -> (i32, i32) {
    %c0_i32 = arith.constant 0 : i32
    %c0_i32_0 = arith.constant 0 : i32
    %c0_i32_1 = arith.constant 0 : i32
    return %c0_i32, %c0_i32_0 : i32, i32
  }
  func.func @transform_8(%arg0: i32) -> (i32, i32) {
    %c0_i32 = arith.constant 0 : i32
    %c0_i32_0 = arith.constant 0 : i32
    return %arg0, %c0_i32 : i32, i32
  }
}

</mosaic_0001>

<bundles_post_ra>
// kernel: tpu_custom_call.1
= control target key start
LH: loop header
LB: loop body
LE: loop exit
PB: predicated region body
PF: predicated region fallthrough
CT: control target
= control target key end

     0   :  { %13 = vsyncpa [#allocation3], 0  ;;  %s876_s0 = inlined_call_operand.hbm [shape: f32[8,16], index: 0, kind: input, shape index: {}]   ;;  %s877_s1 = inlined_call_operand.hbm [shape: f32[8,128], index: 1, kind: input, shape index: {}]   ;;  %s878_s2 = inlined_call_operand.hbm [shape: f32[16,384], index: 2, kind: input, shape index: {}]   ;;  %s879_s3 = inlined_call_operand.hbm [shape: f32[128,384], index: 3, kind: input, shape index: {}]   ;;  %s880_s4 = inlined_call_operand.vmem [shape: f32[1,256], index: 4, kind: input, shape index: {}]   ;;  %s881_s5 = inlined_call_operand.hbm [shape: f32[384,128], index: 5, kind: input, shape index: {}]   ;;  %s882_s6 = inlined_call_operand.vmem [shape: f32[1,128], index: 6, kind: input, shape index: {}]   ;;  %s883_s7 = inlined_call_operand.hbm [shape: f32[128,256], index: 7, kind: input, shape index: {}]   ;;  %s884_s8 = inlined_call_operand.hbm [shape: f32[8,128], index: 8, kind: output, shape index: {}]  }
   0x1   :  { %14 = vsyncpa [#allocation6], 0 }
   0x2   :  { %15 = vsyncpa [#allocation9], 0 }
   0x3   :  { %16 = vsyncpa [#allocation12], 0  ;;  %s34_s29 = sshll.u32 %s877_s1, 4  ;;  %s35_s29 = int_to_ptr.hbm [resolvable:$true] %s34_s29 }
   0x4   :  { %17 = vsyncpa [#allocation4], 0  ;;  %s774_s30 = smov [#allocation5]   ;;  %s57_s12 = sshll.u32 %s879_s3, 4  ;;  %s58_s12 = int_to_ptr.hbm [resolvable:$true] %s57_s12 }
   0x5   :  { %s36_s9 = sshll.u32 %s774_s30, 4  ;;  %s775_s13 = smov [#allocation8]   ;;  %s37_s9 = int_to_ptr.vmem [resolvable:$true] %s36_s9 }
   0x6   :  { %39 = dma.hbm_to_vmem [thread:$0]  %s35_s29, 128, %s37_s9, [#allocation6]  }
   0x7   :  { %s59_s14 = sshll.u32 %s775_s13, 4  ;;  %s23_s17 = sshll.u32 %s876_s0, 4  ;;  %s60_s14 = int_to_ptr.vmem [resolvable:$true] %s59_s14  ;;  %s24_s17 = int_to_ptr.hbm [resolvable:$true] %s23_s17 }
   0x8   :  { %s776_s1 = smov 384   ;;  %s777_s18 = smov 24  }
   0x9   :  { %65 = dma.hbm_to_vmem [thread:$0]  %s58_s12, 6144, %s60_s14, [#allocation9], %s776_s1, %s776_s1, %s777_s18  }
   0xa   :  { %s44_s21 = sshll.u32 %s878_s2, 4  ;;  %s778_s22 = smov [#allocation2]   ;;  %s45_s21 = int_to_ptr.hbm [resolvable:$true] %s44_s21 }
   0xb   :  { %s25_s23 = sshll.u32 %s778_s22, 4  ;;  %s779_s3 = smov [#allocation7]   ;;  %s26_s23 = int_to_ptr.vmem [resolvable:$true] %s25_s23 }
   0xc   :  { %28 = dma.hbm_to_vmem [thread:$0]  %s24_s17, 128, %s26_s23, [#allocation3]  }
   0xd   :  { %s46_s24 = sshll.u32 %s779_s3, 4  ;;  %s72_s0 = sshll.u32 %s881_s5, 4  ;;  %s47_s24 = int_to_ptr.vmem [resolvable:$true] %s46_s24  ;;  %s73_s0 = int_to_ptr.hbm [resolvable:$true] %s72_s0 }
   0xe   :  { %52 = dma.hbm_to_vmem [thread:$0]  %s45_s21, 768, %s47_s24, [#allocation6], %s776_s1, %s776_s1, %s777_s18  }
   0xf   :  { %s780_s27 = smov [#allocation10]   ;;  %s87_s2 = sshll.u32 %s883_s7, 4  ;;  %s88_s2 = int_to_ptr.hbm [resolvable:$true] %s87_s2 }
  0x10   :  { %s74_s28 = sshll.u32 %s780_s27, 4  ;;  %s781_s9 = smov 128   ;;  %s75_s28 = int_to_ptr.vmem [resolvable:$true] %s74_s28 }
  0x11   :  { %s782_s10 = smov 8   ;;  %s783_s11 = smov [#allocation11]  }
  0x12   :  { %80 = dma.hbm_to_vmem [thread:$0]  %s73_s0, 6144, %s75_s28, [#allocation9], %s781_s9, %s781_s9, %s782_s10  }
  0x13   :  { %s89_s12 = sshll.u32 %s783_s11, 4  ;;  %s784_s13 = smov 256   ;;  %s90_s12 = int_to_ptr.vmem [resolvable:$true] %s89_s12 }
  0x14   :  { %s785_s14 = smov 16  }
  0x15   :  { %95 = dma.hbm_to_vmem [thread:$0]  %s88_s2, 4096, %s90_s12, [#allocation12], %s784_s13, %s784_s13, %s785_s14  }
  0x16   :  { %764 = dma.done.wait [#allocation3], 128  }
  0x17   :  { %765 = vsyncadd [#allocation3], 4294967168 }
  0x18   :  { %766 = dma.done.wait [#allocation6], 896  }
  0x19   :  { %767 = vsyncadd [#allocation6], 4294966400 }
  0x1a   :  { %768 = dma.done.wait [#allocation9], 12288  }
  0x1b   :  { %769 = vsyncadd [#allocation9], 4294955008 }
  0x1c   :  { %770 = dma.done.wait [#allocation12], 4096  }
  0x1d   :  { %771 = vsyncadd [#allocation12], 4294963200  ;;  %v237_v0 = vld [vmem:[#allocation8 + $0x168] sm:$0xff]  ;;  %v234_v1 = vld [vmem:[#allocation8 + $0x150] sm:$0xff]  ;;  %vm128_vm0 = vcmask 130048   ;;  %s550_s18 = sshll.u32 %s884_s8, 4  ;;  %s551_s18 = int_to_ptr.hbm [resolvable:$true] %s550_s18 }
  0x1e   :  { %240 = vmatpush.msra.mxu3 %v237_v0  ;;  %v231_v2 = vld [vmem:[#allocation8 + $0x138] sm:$0xff]  ;;  %v125_v3 = vld [vmem:[#allocation7 + $0x18] sm:$0xff]  ;;  %v122_v4 = vld [vmem:[#allocation7] sm:$0xff] }
  0x1f   :  { %146 = vmatpush.msra.mxu0 %v125_v3  ;;  %v238_v5 = vld [vmem:[#allocation8 + $0x170] sm:$0xff]  ;;  %v228_v6 = vld [vmem:[#allocation8 + $0x120] sm:$0xff]  ;;  %v235_v7 = vld [vmem:[#allocation8 + $0x158] sm:$0xff] }
  0x20   :  { %241 = vmatpush.msra.mxu3 %v234_v1  ;;  %v126_v8 = vld [vmem:[#allocation7 + $0x20] sm:$0xff]  ;;  %v225_v9 = vld [vmem:[#allocation8 + $0x108] sm:$0xff]  ;;  %v123_v10 = vld [vmem:[#allocation7 + $0x8] sm:$0xff] }
  0x21   :  { %147 = vmatpush.msra.mxu0 %v122_v4  ;;  %166 = vmatpush.msra.mxu1 %v126_v8  ;;  %v232_v11 = vld [vmem:[#allocation8 + $0x140] sm:$0xff]  ;;  %v239_v12 = vld [vmem:[#allocation8 + $0x178] sm:$0xff]  ;;  %v222_v13 = vld [vmem:[#allocation8 + $0xf0] sm:$0xff] }
  0x22   :  { %242 = vmatpush.msra.mxu3 %v231_v2  ;;  %v236_v14 = vld [vmem:[#allocation8 + $0x160] sm:$0xff]  ;;  %v229_v15 = vld [vmem:[#allocation8 + $0x128] sm:$0xff]  ;;  %v219_v16 = vld [vmem:[#allocation8 + $0xd8] sm:$0xff] }
  0x23   :  { %260 = vmatpush.msrb.mxu0 %v238_v5  ;;  %167 = vmatpush.msra.mxu1 %v123_v10  ;;  %v233_v17 = vld [vmem:[#allocation8 + $0x148] sm:$0xff]  ;;  %v226_v18 = vld [vmem:[#allocation8 + $0x110] sm:$0xff]  ;;  %v216_v19 = vld [vmem:[#allocation8 + $0xc0] sm:$0xff] }
  0x24   :  { %243 = vmatpush.msra.mxu3 %v228_v6  ;;  %v230_v20 = vld [vmem:[#allocation8 + $0x130] sm:$0xff]  ;;  %v223_v21 = vld [vmem:[#allocation8 + $0xf8] sm:$0xff]  ;;  %v120_v22 = vld [vmem:[#allocation2] sm:$0xff] }
  0x25   :  { %261 = vmatpush.msrb.mxu0 %v235_v7  ;;  %280 = vmatpush.msrb.mxu1 %v239_v12  ;;  %v213_v23 = vld [vmem:[#allocation8 + $0xa8] sm:$0xff]  ;;  %v227_v24 = vld [vmem:[#allocation8 + $0x118] sm:$0xff]  ;;  %v220_v25 = vld [vmem:[#allocation8 + $0xe0] sm:$0xff] }
  0x26   :  { %244 = vmatpush.msra.mxu3 %v225_v9  ;;  %564 = vmatmul.msk.f32.vlgmr.msra.gmra.mxu1 %vm128_vm0, %v120_v22  ;;  %v127_v26 = vld [vmem:[#allocation7 + $0x28] sm:$0xff]  ;;  %v210_v27 = vld [vmem:[#allocation8 + $0x90] sm:$0xff]  ;;  %v224_v28 = vld [vmem:[#allocation8 + $0x100] sm:$0xff] }
  0x27   :  { %262 = vmatpush.msrb.mxu0 %v232_v11  ;;  %281 = vmatpush.msrb.mxu1 %v236_v14  ;;  %v124_v29 = vld [vmem:[#allocation7 + $0x10] sm:$0xff]  ;;  %v217_v30 = vld [vmem:[#allocation8 + $0xc8] sm:$0xff]  ;;  %v207_v31 = vld [vmem:[#allocation8 + $0x78] sm:$0xff] }
  0x28   :  { %245 = vmatpush.msra.mxu3 %v222_v13  ;;  %186 = vmatpush.msra.mxu2 %v127_v26  ;;  %v214_v32 = vld [vmem:[#allocation8 + $0xb0] sm:$0xff]  ;;  %v221_v33 = vld [vmem:[#allocation8 + $0xe8] sm:$0xff]  ;;  %v204_v34 = vld [vmem:[#allocation8 + $0x60] sm:$0xff] }
  0x29   :  { %263 = vmatpush.msrb.mxu0 %v229_v15  ;;  %282 = vmatpush.msrb.mxu1 %v233_v17  ;;  %v348_v35 = vld [vmem:[#allocation10 + $0x78] sm:$0xff]  ;;  %v218_v37 = vld [vmem:[#allocation8 + $0xd0] sm:$0xff]  ;;  %v201_v38 = vld [vmem:[#allocation8 + $0x48] sm:$0xff] }
  0x2a   :  { %246 = vmatpush.msra.mxu3 %v219_v16  ;;  %187 = vmatpush.msra.mxu2 %v124_v29  ;;  %v211_v36 = vld [vmem:[#allocation8 + $0x98] sm:$0xff]  ;;  %v347_v39 = vld [vmem:[#allocation10 + $0x70] sm:$0xff]  ;;  %v208_v40 = vld [vmem:[#allocation8 + $0x80] sm:$0xff] }
  0x2b   :  { %264 = vmatpush.msrb.mxu0 %v226_v18  ;;  %283 = vmatpush.msrb.mxu1 %v230_v20  ;;  %v215_v41 = vld [vmem:[#allocation8 + $0xb8] sm:$0xff]  ;;  %v198_v42 = vld [vmem:[#allocation8 + $0x30] sm:$0xff]  ;;  %v346_v43 = vld [vmem:[#allocation10 + $0x68] sm:$0xff] }
  0x2c   :  { %247 = vmatpush.msra.mxu3 %v216_v19  ;;  %565 = vmatmul.msk.f32.vlgmr.msra.gmra.mxu2 %vm128_vm0, %v120_v22  ;;  %v205_v44 = vld [vmem:[#allocation8 + $0x68] sm:$0xff]  ;;  %v212_v45 = vld [vmem:[#allocation8 + $0xa0] sm:$0xff]  ;;  %v195_v46 = vld [vmem:[#allocation8 + $0x18] sm:$0xff] }
  0x2d   :  { %265 = vmatpush.msrb.mxu0 %v223_v21  ;;  %284 = vmatpush.msrb.mxu1 %v227_v24  ;;  %v202_v47 = vld [vmem:[#allocation8 + $0x50] sm:$0xff]  ;;  %v209_v48 = vld [vmem:[#allocation8 + $0x88] sm:$0xff]  ;;  %v192_v49 = vld [vmem:[#allocation8] sm:$0xff] }
  0x2e   :  { %248 = vmatpush.msra.mxu3 %v213_v23  ;;  %563 = vmatmul.msk.f32.vlgmr.msra.gmra.mxu0 %vm128_vm0, %v120_v22  ;;  %v121_v50 = vld [vmem:[#allocation5] sm:$0xff]  ;;  %v199_v51 = vld [vmem:[#allocation8 + $0x38] sm:$0xff]  ;;  %v206_v52 = vld [vmem:[#allocation8 + $0x70] sm:$0xff] }
  0x2f   :  { %266 = vmatpush.msrb.mxu0 %v220_v25  ;;  %285 = vmatpush.msrb.mxu1 %v224_v28  ;;  %v364_v53 = vld [vmem:[#allocation10 + $0xf8] sm:$0xff]  ;;  %v196_v54 = vld [vmem:[#allocation8 + $0x20] sm:$0xff]  ;;  %v363_v56 = vld [vmem:[#allocation10 + $0xf0] sm:$0xff] }
  0x30   :  { %249 = vmatpush.msra.mxu3 %v210_v27  ;;  %385 = vmatpush.msrb.mxu2 %v348_v35  ;;  %v203_v55 = vld [vmem:[#allocation8 + $0x58] sm:$0xff]  ;;  %v193_v57 = vld [vmem:[#allocation8 + $0x8] sm:$0xff]  ;;  %v200_v58 = vld [vmem:[#allocation8 + $0x40] sm:$0xff] }
  0x31   :  { %267 = vmatpush.msrb.mxu0 %v217_v30  ;;  %286 = vmatpush.msrb.mxu1 %v221_v33  ;;  %v197_v59 = vld [vmem:[#allocation8 + $0x28] sm:$0xff]  ;;  %v194_v60 = vld [vmem:[#allocation8 + $0x10] sm:$0xff]  ;;  %v345_v61 = vld [vmem:[#allocation10 + $0x60] sm:$0xff] }
  0x32   :  { %250 = vmatpush.msra.mxu3 %v207_v31  ;;  %386 = vmatpush.msrb.mxu2 %v347_v39  ;;  %v362_v62 = vld [vmem:[#allocation10 + $0xe8] sm:$0xff]  ;;  %v344_v63 = vld [vmem:[#allocation10 + $0x58] sm:$0xff]  ;;  %v361_v0 = vld [vmem:[#allocation10 + $0xe0] sm:$0xff] }
  0x33   :  { %268 = vmatpush.msrb.mxu0 %v214_v32  ;;  %287 = vmatpush.msrb.mxu1 %v218_v37  ;;  %v343_v1 = vld [vmem:[#allocation10 + $0x50] sm:$0xff]  ;;  %v360_v2 = vld [vmem:[#allocation10 + $0xd8] sm:$0xff]  ;;  %v342_v4 = vld [vmem:[#allocation10 + $0x48] sm:$0xff] }
  0x34   :  { %251 = vmatpush.msra.mxu3 %v204_v34  ;;  %387 = vmatpush.msrb.mxu2 %v346_v43  ;;  %v380_v3 = vld [vmem:[#allocation10 + $0x178] sm:$0xff]  ;;  %v359_v5 = vld [vmem:[#allocation10 + $0xd0] sm:$0xff]  ;;  %v341_v7 = vld [vmem:[#allocation10 + $0x40] sm:$0xff] }
  0x35   :  { %269 = vmatpush.msrb.mxu0 %v211_v36  ;;  %288 = vmatpush.msrb.mxu1 %v215_v41  ;;  %v379_v6 = vld [vmem:[#allocation10 + $0x170] sm:$0xff]  ;;  %v358_v8 = vld [vmem:[#allocation10 + $0xc8] sm:$0xff]  ;;  %v340_v10 = vld [vmem:[#allocation10 + $0x38] sm:$0xff] }
  0x36   :  { %252 = vmatpush.msra.mxu3 %v201_v38  ;;  %388 = vmatpush.msrb.mxu2 %v345_v61  ;;  %v378_v9 = vld [vmem:[#allocation10 + $0x168] sm:$0xff]  ;;  %v357_v11 = vld [vmem:[#allocation10 + $0xc0] sm:$0xff]  ;;  %v339_v13 = vld [vmem:[#allocation10 + $0x30] sm:$0xff] }
  0x37   :  { %270 = vmatpush.msrb.mxu0 %v208_v40  ;;  %289 = vmatpush.msrb.mxu1 %v212_v45  ;;  %v377_v12 = vld [vmem:[#allocation10 + $0x160] sm:$0xff]  ;;  %v356_v14 = vld [vmem:[#allocation10 + $0xb8] sm:$0xff]  ;;  %v338_v16 = vld [vmem:[#allocation10 + $0x28] sm:$0xff] }
  0x38   :  { %253 = vmatpush.msra.mxu3 %v198_v42  ;;  %389 = vmatpush.msrb.mxu2 %v344_v63  ;;  %v376_v15 = vld [vmem:[#allocation10 + $0x158] sm:$0xff]  ;;  %v355_v17 = vld [vmem:[#allocation10 + $0xb0] sm:$0xff]  ;;  %v337_v19 = vld [vmem:[#allocation10 + $0x20] sm:$0xff] }
  0x39   :  { %271 = vmatpush.msrb.mxu0 %v205_v44  ;;  %290 = vmatpush.msrb.mxu1 %v209_v48  ;;  %v375_v18 = vld [vmem:[#allocation10 + $0x150] sm:$0xff]  ;;  %v354_v20 = vld [vmem:[#allocation10 + $0xa8] sm:$0xff]  ;;  %v336_v22 = vld [vmem:[#allocation10 + $0x18] sm:$0xff] }
  0x3a   :  { %254 = vmatpush.msra.mxu3 %v195_v46  ;;  %390 = vmatpush.msrb.mxu2 %v343_v1  ;;  %v374_v21 = vld [vmem:[#allocation10 + $0x148] sm:$0xff]  ;;  %v353_v23 = vld [vmem:[#allocation10 + $0xa0] sm:$0xff]  ;;  %v335_v25 = vld [vmem:[#allocation10 + $0x10] sm:$0xff] }
  0x3b   :  { %272 = vmatpush.msrb.mxu0 %v202_v47  ;;  %291 = vmatpush.msrb.mxu1 %v206_v52  ;;  %v373_v24 = vld [vmem:[#allocation10 + $0x140] sm:$0xff]  ;;  %v352_v26 = vld [vmem:[#allocation10 + $0x98] sm:$0xff]  ;;  %v334_v29 = vld [vmem:[#allocation10 + $0x8] sm:$0xff] }
  0x3c   :  { %255 = vmatpush.msra.mxu3 %v192_v49  ;;  %391 = vmatpush.msrb.mxu2 %v342_v4  ;;  %v372_v27 = vld [vmem:[#allocation10 + $0x138] sm:$0xff]  ;;  %v351_v30 = vld [vmem:[#allocation10 + $0x90] sm:$0xff]  ;;  %v333_v32 = vld [vmem:[#allocation10] sm:$0xff] }
  0x3d   :  { %256 = vmatmul.f32.vlgmr.msra.gmra.mxu3 %v121_v50  ;;  %273 = vmatpush.msrb.mxu0 %v199_v51  ;;  %v371_v31 = vld [vmem:[#allocation10 + $0x130] sm:$0xff]  ;;  %v350_v33 = vld [vmem:[#allocation10 + $0x88] sm:$0xff]  ;;  %v349_v35 = vld [vmem:[#allocation10 + $0x80] sm:$0xff] }
  0x3e   :  { %405 = vmatpush.msrb.mxu3 %v364_v53  ;;  %292 = vmatpush.msrb.mxu1 %v203_v55  ;;  %v370_v34 = vld [vmem:[#allocation10 + $0x128] sm:$0xff]  ;;  %v369_v36 = vld [vmem:[#allocation10 + $0x120] sm:$0xff]  ;;  %v368_v38 = vld [vmem:[#allocation10 + $0x118] sm:$0xff] }
  0x3f   :  { %274 = vmatpush.msrb.mxu0 %v196_v54  ;;  %392 = vmatpush.msrb.mxu2 %v341_v7  ;;  %v302_v40 = vld [vmem:[%s880_s4] sm:$0x3]  ;;  %v367_v41 = vld [vmem:[#allocation10 + $0x110] sm:$0xff]  ;;  %v366_v43 = vld [vmem:[#allocation10 + $0x108] sm:$0xff] }
  0x40   :  { %406 = vmatpush.msrb.mxu3 %v363_v56  ;;  %293 = vmatpush.msrb.mxu1 %v200_v58  ;;  %v304_v44 = vperm.slane %v302_v40, 0  ;;  %v365_v46 = vld [vmem:[#allocation10 + $0x100] sm:$0xff]  ;;  %v305_v56 = vperm.slane %v302_v40, 1  ;;  %v495_v7 = vld [vmem:[#allocation11 + $0xf8] sm:$0xff] }
  0x41   :  { %275 = vmatpush.msrb.mxu0 %v193_v57  ;;  %393 = vmatpush.msrb.mxu2 %v340_v10  ;;  %v490_v10 = vld [vmem:[#allocation11 + $0xd0] sm:$0xff] }
  0x42   :  { %276 = vmatmul.f32.vlgmr.msrb.gmra.mxu0 %v121_v50  ;;  %294 = vmatpush.msrb.mxu1 %v197_v59 }
  0x43   :  { %407 = vmatpush.msrb.mxu3 %v362_v62  ;;  %425 = vmatpush.msra.mxu0 %v380_v3 }
  0x44   :  { %295 = vmatpush.msrb.mxu1 %v194_v60  ;;  %394 = vmatpush.msrb.mxu2 %v339_v13  ;;  %v489_v13 = vld [vmem:[#allocation11 + $0xc8] sm:$0xff] }
  0x45   :  { %296 = vmatmul.f32.vlgmr.msrb.gmra.mxu1 %v121_v50  ;;  %408 = vmatpush.msrb.mxu3 %v361_v0 }
  0x46   :  { %426 = vmatpush.msra.mxu0 %v379_v6  ;;  %395 = vmatpush.msrb.mxu2 %v338_v16  ;;  %v494_v6 = vld [vmem:[#allocation11 + $0xf0] sm:$0xff]  ;;  %v484_v16 = vld [vmem:[#allocation11 + $0xa0] sm:$0xff] }
  0x47   :  { %409 = vmatpush.msrb.mxu3 %v360_v2  ;;  %496 = vmatpush.msra.mxu1 %v494_v6 }
  0x48   :  { %427 = vmatpush.msra.mxu0 %v378_v9  ;;  %396 = vmatpush.msrb.mxu2 %v337_v19  ;;  %v493_v9 = vld [vmem:[#allocation11 + $0xe8] sm:$0xff]  ;;  %v483_v19 = vld [vmem:[#allocation11 + $0x98] sm:$0xff] }
  0x49   :  { %410 = vmatpush.msrb.mxu3 %v359_v5 }
  0x4a   :  { %428 = vmatpush.msra.mxu0 %v377_v12  ;;  %397 = vmatpush.msrb.mxu2 %v336_v22  ;;  %v488_v12 = vld [vmem:[#allocation11 + $0xc0] sm:$0xff]  ;;  %v478_v22 = vld [vmem:[#allocation11 + $0x70] sm:$0xff] }
  0x4b   :  { %411 = vmatpush.msrb.mxu3 %v358_v8  ;;  %v492_v8 = vld [vmem:[#allocation11 + $0xe0] sm:$0xff] }
  0x4c   :  { %429 = vmatpush.msra.mxu0 %v376_v15  ;;  %398 = vmatpush.msrb.mxu2 %v335_v25  ;;  %v487_v15 = vld [vmem:[#allocation11 + $0xb8] sm:$0xff]  ;;  %v477_v25 = vld [vmem:[#allocation11 + $0x68] sm:$0xff] }
  0x4d   :  { %412 = vmatpush.msrb.mxu3 %v357_v11  ;;  %497 = vmatpush.msra.mxu1 %v492_v8  ;;  %v491_v11 = vld [vmem:[#allocation11 + $0xd8] sm:$0xff] }
  0x4e   :  { %430 = vmatpush.msra.mxu0 %v375_v18  ;;  %399 = vmatpush.msrb.mxu2 %v334_v29  ;;  %v482_v18 = vld [vmem:[#allocation11 + $0x90] sm:$0xff]  ;;  %v473_v29 = vld [vmem:[#allocation11 + $0x48] sm:$0xff] }
  0x4f   :  { %413 = vmatpush.msrb.mxu3 %v356_v14  ;;  %498 = vmatpush.msra.mxu1 %v490_v10  ;;  %v486_v14 = vld [vmem:[#allocation11 + $0xb0] sm:$0xff] }
  0x50   :  { %431 = vmatpush.msra.mxu0 %v374_v21  ;;  %400 = vmatpush.msrb.mxu2 %v333_v32  ;;  %v481_v21 = vld [vmem:[#allocation11 + $0x88] sm:$0xff]  ;;  %v471_v32 = vld [vmem:[#allocation11 + $0x38] sm:$0xff] }
  0x51   :  { %414 = vmatpush.msrb.mxu3 %v355_v17  ;;  %499 = vmatpush.msra.mxu1 %v488_v12  ;;  %v485_v17 = vld [vmem:[#allocation11 + $0xa8] sm:$0xff] }
  0x52   :  { %432 = vmatpush.msra.mxu0 %v373_v24  ;;  %516 = vmatpush.msra.mxu2 %v495_v7  ;;  %v476_v24 = vld [vmem:[#allocation11 + $0x60] sm:$0xff] }
  0x53   :  { %415 = vmatpush.msrb.mxu3 %v354_v20  ;;  %500 = vmatpush.msra.mxu1 %v486_v14  ;;  %v480_v20 = vld [vmem:[#allocation11 + $0x80] sm:$0xff] }
  0x54   :  { %433 = vmatpush.msra.mxu0 %v372_v27  ;;  %517 = vmatpush.msra.mxu2 %v493_v9  ;;  %v475_v27 = vld [vmem:[#allocation11 + $0x58] sm:$0xff] }
  0x55   :  { %416 = vmatpush.msrb.mxu3 %v353_v23  ;;  %501 = vmatpush.msra.mxu1 %v484_v16  ;;  %v479_v23 = vld [vmem:[#allocation11 + $0x78] sm:$0xff] }
  0x56   :  { %434 = vmatpush.msra.mxu0 %v371_v31  ;;  %518 = vmatpush.msra.mxu2 %v491_v11  ;;  %v470_v31 = vld [vmem:[#allocation11 + $0x30] sm:$0xff] }
  0x57   :  { %417 = vmatpush.msrb.mxu3 %v352_v26  ;;  %502 = vmatpush.msra.mxu1 %v482_v18  ;;  %v474_v26 = vld [vmem:[#allocation11 + $0x50] sm:$0xff] }
  0x58   :  { %435 = vmatpush.msra.mxu0 %v370_v34  ;;  %519 = vmatpush.msra.mxu2 %v489_v13  ;;  %v468_v34 = vld [vmem:[#allocation11 + $0x20] sm:$0xff] }
  0x59   :  { %418 = vmatpush.msrb.mxu3 %v351_v30  ;;  %503 = vmatpush.msra.mxu1 %v480_v20  ;;  %v581_v30 = vld [vmem:[%s882_s6] ss:$0 sm:$0xff]  ;;  %s786_s6 = smov [#allocation13]  }
  0x5a   :  { %436 = vmatpush.msra.mxu0 %v369_v36  ;;  %520 = vmatpush.msra.mxu2 %v487_v15  ;;  %s548_s16 = sshll.u32 %s786_s6, 4  ;;  %s549_s16 = int_to_ptr.vmem [resolvable:$true] %s548_s16 }
  0x5b   :  { %419 = vmatpush.msrb.mxu3 %v350_v33  ;;  %504 = vmatpush.msra.mxu1 %v478_v22 }
  0x5c   :  { %437 = vmatpush.msra.mxu0 %v368_v38  ;;  %521 = vmatpush.msra.mxu2 %v485_v17  ;;  %v467_v38 = vld [vmem:[#allocation11 + $0x18] sm:$0xff] }
  0x5d   :  { %420 = vmatpush.msrb.mxu3 %v349_v35  ;;  %505 = vmatpush.msra.mxu1 %v476_v24  ;;  %v469_v35 = vld [vmem:[#allocation11 + $0x28] sm:$0xff] }
  0x5e   :  { %438 = vmatpush.msra.mxu0 %v367_v41  ;;  %522 = vmatpush.msra.mxu2 %v483_v19  ;;  %v464_v41 = vld [vmem:[#allocation11] sm:$0xff] }
  0x5f   :  { %506 = vmatpush.msra.mxu1 %v474_v26 }
  0x60   :  { %439 = vmatpush.msra.mxu0 %v366_v43  ;;  %523 = vmatpush.msra.mxu2 %v481_v21 }
  0x62   :  { %440 = vmatpush.msra.mxu0 %v365_v46  ;;  %524 = vmatpush.msra.mxu2 %v479_v23 }
  0x64   :  { %525 = vmatpush.msra.mxu2 %v477_v25 }
  0x66   :  { %526 = vmatpush.msra.mxu2 %v475_v27 }
  0x68   :  { %527 = vmatpush.msra.mxu2 %v473_v29 }
  0x6a   :  { %528 = vmatpush.msra.mxu2 %v471_v32 }
  0x6c   :  { %529 = vmatpush.msra.mxu2 %v469_v35 }
  0x6e   :  { %530 = vmatpush.msra.mxu2 %v467_v38 }
  0xa3   :  { %v169_v37 = vpop.f32.mrf.mxu1 }
  0xab   :  { %v149_v42 = vpop.f32.mrf.mxu0 }
  0xaf   :  { %v189_v28 = vpop.f32.mrf.mxu2 }
  0xb0   :  { %582 = vtanh.f32 %v189_v28  ;;  %v472_v28 = vld [vmem:[#allocation11 + $0x40] sm:$0xff] }
  0xb1   :  { %507 = vmatpush.msra.mxu1 %v472_v28 }
  0xb3   :  { %508 = vmatpush.msra.mxu1 %v470_v31 }
  0xb5   :  { %509 = vmatpush.msra.mxu1 %v468_v34 }
  0xb6   :  { %v853_v39 = vpop.eup %582 }
  0xb7   :  { %401 = vmatmul.f32.vlgmr.msrb.gmra.mxu2 %v853_v39 }
  0xbf   :  { %v277_v54 = vpop.f32.mrf.mxu0 }
  0xc0   :  { %v257_v45 = vpop.f32.mrf.mxu3  ;;  %v301_v55 = vadd.f32 %v277_v54, %v169_v37  ;;  %v466_v37 = vld [vmem:[#allocation11 + $0x10] sm:$0xff] }
  0xc1   :  { %v300_v47 = vadd.f32 %v257_v45, %v149_v42  ;;  %v465_v42 = vld [vmem:[#allocation11 + $0x8] sm:$0xff]  ;;  %510 = vmatpush.msra.mxu1 %v466_v37 }
  0xc2   :  { %v297_v49 = vpop.f32.mrf.mxu1  ;;  %v309_v58 = vadd.f32 %v305_v56, %v301_v55  ;;  %531 = vmatpush.msra.mxu2 %v465_v42 }
  0xc3   :  { %v308_v48 = vadd.f32 %v304_v44, %v300_v47  ;;  %584 = vtanh.f32 %v297_v49  ;;  %511 = vmatpush.msra.mxu1 %v464_v41 }
  0xc5   :  { %v566_v50 = vmul.f32 -1.442695, %v308_v48 }
  0xc7   :  { %586 = vpow2.f32 %v566_v50 }
  0xc9   :  { %v859_v51 = vpop.eup %584 }
  0xca   :  { %421 = vmatmul.f32.vlgmr.msrb.gmra.mxu3 %v859_v51 }
  0xcd   :  { %v587_v52 = vpop.eup %586 }
  0xce   :  { %v313_v53 = vadd.f32 1.0, %v587_v52 }
  0xd0   :  { %588 = vrcp.f32 %v313_v53  ;;  %v325_v61 = vand.u32 2147483648, %v313_v53  ;;  %v323_v63 = vand.u32 2147483647, %v313_v53  ;;  %vm319_vm2 = vweird.f32 %v313_v53 }
  0xd1   :  { %590 = vtanh.f32 %v309_v58 }
  0xd2   :  { %v326_v1 = vor.u32 1.1754944e-38, %v325_v61  ;;  %vm324_vm4 = vcmp.eq.f32.partialorder %v323_v63, 8.507059e+37 }
  0xd6   :  { %v589_v57 = vpop.eup %588 }
  0xd7   :  { %v315_v59 = vmul.f32 %v589_v57, %v313_v53  ;;  %vm320_vm1 = vweird.f32 %v589_v57  ;;  %v591_v3 = vpop.eup %590 }
  0xd8   :  { %vm321_vm3 = vmor %vm319_vm2, %vm320_vm1 }
  0xd9   :  { %v316_v60 = vsub.f32 1.0, %v315_v59 }
  0xdb   :  { %v317_v62 = vmul.f32 %v589_v57, %v316_v60 }
  0xdd   :  { %v318_v0 = vadd.f32 %v589_v57, %v317_v62 }
  0xdf   :  { %v322_v2 = vsel %vm321_vm3, %v589_v57, %v318_v0 }
  0xe0   :  { %v327_v4 = vsel %vm324_vm4, %v326_v1, %v322_v2 }
  0xe1   :  { %v862_v5 = vmul.f32 %v591_v3, %v327_v4 }
  0xe3   :  { %441 = vmatmul.f32.vlgmr.msra.gmra.mxu0 %v862_v5  ;;  %v536_v61 = vsub.f32 %v853_v39, %v862_v5  ;;  %v539_v63 = vsub.f32 %v859_v51, %v862_v5 }
 0x13a   :  { %v402_v33 = vpop.f32.mrf.mxu2 }
 0x13b   :  { %v403_v36 = vadd.f32 %v581_v30, %v402_v33 }
 0x14d   :  { %v422_v40 = vpop.f32.mrf.mxu3 }
 0x14e   :  { %v423_v43 = vadd.f32 %v422_v40, %v403_v36 }
 0x160   :  { %v442_v44 = vpop.f32.mrf.mxu0 }
 0x161   :  { %v443_v45 = vadd.f32 %v442_v44, %v423_v43 }
 0x163   :  { %v567_v46 = vmul.f32 -1.442695, %v443_v45 }
 0x165   :  { %592 = vpow2.f32 %v567_v46 }
 0x16b   :  { %v593_v47 = vpop.eup %592 }
 0x16c   :  { %v448_v48 = vadd.f32 1.0, %v593_v47 }
 0x16e   :  { %594 = vrcp.f32 %v448_v48  ;;  %v460_v53 = vand.u32 2147483648, %v448_v48  ;;  %v458_v55 = vand.u32 2147483647, %v448_v48  ;;  %vm454_vm6 = vweird.f32 %v448_v48 }
 0x170   :  { %v461_v57 = vor.u32 1.1754944e-38, %v460_v53  ;;  %vm459_vm8 = vcmp.eq.f32.partialorder %v458_v55, 8.507059e+37 }
 0x174   :  { %v595_v49 = vpop.eup %594 }
 0x175   :  { %v450_v50 = vmul.f32 %v595_v49, %v448_v48  ;;  %vm455_vm5 = vweird.f32 %v595_v49 }
 0x176   :  { %vm456_vm7 = vmor %vm454_vm6, %vm455_vm5 }
 0x177   :  { %v451_v52 = vsub.f32 1.0, %v450_v50 }
 0x179   :  { %v452_v54 = vmul.f32 %v595_v49, %v451_v52 }
 0x17b   :  { %v453_v56 = vadd.f32 %v595_v49, %v452_v54 }
 0x17d   :  { %v457_v58 = vsel %vm456_vm7, %v595_v49, %v453_v56 }
 0x17e   :  { %v462_v59 = vsel %vm459_vm8, %v461_v57, %v457_v58 }
 0x17f   :  { %512 = vmatmul.f32.vlgmr.msra.gmra.mxu1 %v462_v59  ;;  %532 = vmatmul.f32.vlgmr.msra.gmra.mxu2 %v462_v59 }
 0x1fc   :  { %v513_v60 = vpop.f32.mrf.mxu1 }
 0x1fd   :  { %v537_v62 = vmul.f32 %v536_v61, %v513_v60 }
 0x1ff   :  { %v538_v1 = vadd.f32 %v537_v62, %v862_v5 }
 0x202   :  { %v533_v0 = vpop.f32.mrf.mxu2 }
 0x203   :  { %v540_v2 = vmul.f32 %v539_v63, %v533_v0 }
 0x205   :  { %v541_v3 = vadd.f32 %v540_v2, %v538_v1 }
 0x207   :  { %542 = vst [vmem:[#allocation13] sm:$0xff] %v541_v3 }
 0x208   :  { %553 = dma.vmem_to_hbm [thread:$0]  %s549_s16, 128, %s551_s18, [#allocation4]  }
 0x209   :  { %772 = dma.done.wait [#allocation4], 128  }
 0x20a   :  { %773 = vsyncadd [#allocation4], 4294967168 }
 0x20b   :  { %558 = vsyncpa [#allocation3], 1 }
 0x20c   :  { %559 = vsyncpa [#allocation6], 1 }
 0x20d   :  { %560 = vsyncpa [#allocation9], 1 }
 0x20e   :  { %561 = vsyncpa [#allocation12], 1 }
 0x20f   :  { %562 = vsyncpa [#allocation4], 1 }

</bundles_post_ra>
